<compile_context>
chip_gen: v7x
topology: tpu7x:2x2x1
jax: 0.10.0
libtpu: 0.0.40
codegen_flags: <defaults>
</compile_context>

<pallas_src>
import jax
import jax.numpy as jnp
from jax.experimental import pallas as pl
from jax.experimental.pallas import tpu as pltpu


def _round_up(x: int, m: int) -> int:
    return ((x + m - 1) // m) * m


def _choose_tn(n_pad: int, f: int, budget_bytes: int) -> int:
    """Largest column-strip width (multiple of 128, divides n_pad, fits budget)."""
    for tn in (2048, 1024, 512, 256, 128):
        if tn > n_pad or n_pad % tn:
            continue
        if n_pad >= 256 and tn > n_pad // 2:   # keep >=2 blocks for megacore (v7x)
            continue
        need = (n_pad * tn * (2 * 2 + 4)        # bf16 strip (double buf) + f32 cast temp
                + 2 * f * n_pad * 4             # resident h^T
                + 4 * f * tn * 4                # out / self blocks
                + 2 * tn * 4)                   # inv blocks
        if need <= budget_bytes:
            return tn
    return 128


def _fused_call(n_pad: int, f: int, num_layers: int, one_plus_eps: float, add_self: bool):
    """All layers in one kernel; adjacency resident in VMEM (read from HBM once)."""

    def kernel(adjT_ref, hT_ref, inv_ref, out_ref):
        adjT = adjT_ref[...].astype(jnp.float32)      # single in-VMEM cast (0/1 exact)
        inv = inv_ref[...]                            # [1, N_pad]
        h = hT_ref[...]                               # [F, N_pad] f32
        for l in range(num_layers):
            neigh = jnp.dot(h, adjT, preferred_element_type=jnp.float32) * inv
            h = one_plus_eps * h + neigh if add_self else neigh
            out_ref[l, :, :] = h                      # lane-dense (N_pad lanes)

    vmem_need = (n_pad * n_pad * (2 + 4)              # bf16 adj + f32 cast temp
                 + (num_layers + 2) * f * n_pad * 4
                 + n_pad * 4 + (1 << 20))
    return pl.pallas_call(
        kernel,
        out_shape=jax.ShapeDtypeStruct((num_layers, f, n_pad), jnp.float32),
        compiler_params=pltpu.CompilerParams(
            vmem_limit_bytes=min(max(vmem_need, 32 * 2**20), 48 * 2**20)),
    )


def _tiled_layer_call(n_pad: int, f: int, one_plus_eps: float, add_self: bool,
                      budget_bytes: int):
    """One GIN layer, transposed formulation, grid over adjacency column strips."""
    tn = _choose_tn(n_pad, f, budget_bytes)
    n_col = n_pad // tn

    def kernel(*refs):
        if add_self:
            adjT_ref, hT_ref, inv_ref, hself_ref, out_ref = refs
        else:
            adjT_ref, hT_ref, inv_ref, out_ref = refs
            hself_ref = None
        a = adjT_ref[...].astype(jnp.float32)         # [N_pad, TN] 0/1 -> exact
        neigh = jnp.dot(hT_ref[...], a, preferred_element_type=jnp.float32)
        neigh = neigh * inv_ref[...]                  # 'mean' aggregation
        if add_self:                                  # skipped when eps == -1
            neigh = neigh + one_plus_eps * hself_ref[...]
        out_ref[...] = neigh                          # lane-dense [F, TN] store

    in_specs = [
        pl.BlockSpec((n_pad, tn), lambda j: (0, j)),  # adj^T column strip (bf16)
        pl.BlockSpec((f, n_pad), lambda j: (0, 0)),   # h^T, single resident block
        pl.BlockSpec((1, tn), lambda j: (0, j)),      # inverse in-degree lane vector
    ]
    if add_self:
        in_specs.append(pl.BlockSpec((f, tn), lambda j: (0, j)))

    vmem_need = (n_pad * tn * (2 * 2 + 4) + 2 * f * n_pad * 4
                 + 4 * f * tn * 4 + 2 * tn * 4 + (1 << 20))
    return pl.pallas_call(
        kernel,
        out_shape=jax.ShapeDtypeStruct((f, n_pad), jnp.float32),
        grid=(n_col,),
        in_specs=in_specs,
        out_specs=pl.BlockSpec((f, tn), lambda j: (0, j)),
        compiler_params=pltpu.CompilerParams(
            dimension_semantics=("parallel",),        # >=2 blocks -> both v7x TCs
            vmem_limit_bytes=min(max(vmem_need, 32 * 2**20), 48 * 2**20)),
    )


def make_gin_noparam(num_layers: int = 2, init_eps: float = -1.0,
                     max_fused_nodes: int = 2048,
                     vmem_budget_bytes: int = 36 * 2**20):
    """Returns a jitted callable (adj, h) -> concat([h, h1, ..., h_L], -1).

    adj: [N, N]; adj[v, u] != 0 iff edge u -> v (treated as a binary edge mask,
         matching DGL's unweighted 'mean' aggregator).
    h:   [N, F] node features.
    """
    one_plus_eps = 1.0 + float(init_eps)
    add_self = (one_plus_eps != 0.0)

    # TODO(synk): for repeated calls on the same graph, expose the padded bf16
    # adj^T / inv-degree preprocessing separately so it can be cached by the
    # caller instead of recomputed every invocation.
    def forward(adj: jax.Array, h: jax.Array) -> jax.Array:
        N, F = h.shape
        assert adj.shape == (N, N)
        h = h.astype(jnp.float32)

        # Pad only to a multiple of 128 (decoupled from tile size).
        N_pad = _round_up(N, 128)

        # Binary adjacency; layer-invariant inverse in-degree ([1, N_pad]).
        adj_bin = (adj != 0).astype(jnp.float32)
        deg = jnp.sum(adj_bin, axis=-1)
        inv = jnp.where(deg > 0, 1.0 / deg, 0.0)
        inv_row = jnp.zeros((1, N_pad), jnp.float32).at[0, :N].set(inv)

        # Transposed, padded inputs: adj^T (bf16, exact for 0/1) and h^T (f32).
        adjT_p = jnp.zeros((N_pad, N_pad), jnp.bfloat16).at[:N, :N].set(
            adj_bin.T.astype(jnp.bfloat16))
        hT_p = jnp.zeros((F, N_pad), jnp.float32).at[:, :N].set(h.T)

        if N_pad <= max_fused_nodes:
            # Fused: adjacency read from HBM once for all layers.
            outs_T = _fused_call(N_pad, F, num_layers, one_plus_eps, add_self)(
                adjT_p, hT_p, inv_row)
            layer_hT = [outs_T[l] for l in range(num_layers)]
        else:
            layer_call = _tiled_layer_call(N_pad, F, one_plus_eps, add_self,
                                           vmem_budget_bytes)
            layer_hT = []
            hT_cur = hT_p
            for _ in range(num_layers):
                if add_self:
                    hT_cur = layer_call(adjT_p, hT_cur, inv_row, hT_cur)
                else:
                    hT_cur = layer_call(adjT_p, hT_cur, inv_row)
                layer_hT.append(hT_cur)

        outs = [h] + [hT[:, :N].T for hT in layer_hT]
        return jnp.concatenate(outs, axis=-1)

    return jax.jit(forward)


def reference(adj, h, num_layers=2, init_eps=-1.0):
    """Pure-JAX reference of the same forward pass."""
    deg = jnp.sum(adj, axis=-1, keepdims=True)
    adj_norm = adj * jnp.where(deg > 0, 1.0 / deg, 0.0)
    outs = [h]
    h_cur = h
    for _ in range(num_layers):
        h_cur = (1.0 + init_eps) * h_cur + adj_norm @ h_cur
        outs.append(h_cur)
    return jnp.concatenate(outs, axis=-1)


if __name__ == "__main__":
    key = jax.random.PRNGKey(0)
    k_adj, k_feat = jax.random.split(key)

    # Small synthetic graph; N=208 is deliberately not a multiple of 128 so the
    # padding path is exercised (N_pad=256 -> tiled path runs a 2-block grid).
    N, F, num_layers = 208, 8, 2
    adj = jax.random.bernoulli(k_adj, p=0.1, shape=(N, N)).astype(jnp.float32)
    adj = adj * (1.0 - jnp.eye(N, dtype=jnp.float32))     # no self-loops
    h = jax.random.normal(k_feat, (N, F), dtype=jnp.float32)

    ref = reference(adj, h, num_layers=num_layers, init_eps=-1.0)

    # Path 1 (default): fused kernel, adjacency resident in VMEM, read once.
    gin_fused = make_gin_noparam(num_layers=num_layers, init_eps=-1.0)
    out_fused = jax.block_until_ready(gin_fused(adj, h))
    assert out_fused.shape == (N, (num_layers + 1) * F)
    assert jnp.allclose(out_fused, ref, atol=2e-5, rtol=1e-5)

    # Path 2: tiled per-layer kernel (forced), covers the large-graph fallback.
    gin_tiled = make_gin_noparam(num_layers=num_layers, init_eps=-1.0,
                                 max_fused_nodes=0)
    out_tiled = jax.block_until_ready(gin_tiled(adj, h))
    assert out_tiled.shape == (N, (num_layers + 1) * F)
    assert jnp.allclose(out_tiled, ref, atol=2e-5, rtol=1e-5)

    # TODO(synk): the PyTorch forward does `print(h_final)`; omitted so the
    # script prints exactly the success marker.
    print("KERNEL_OK")
</pallas_src>

<mosaic_0001>
module attributes {stable_mosaic.version = 11 : i64} {
  func.func @kernel(%arg0: memref<256x256xbf16, #tpu.memory_space<vmem>>, %arg1: memref<8x256xf32, #tpu.memory_space<vmem>>, %arg2: memref<1x256xf32, #tpu.memory_space<vmem>>, %arg3: memref<2x8x256xf32, #tpu.memory_space<vmem>>) attributes {dimension_semantics = [], scalar_prefetch = 0 : i64, scratch_operands = 0 : i64, tpu.core_type = #tpu.core_type<tc>} {
    %c0 = arith.constant 0 : index
    %c0_0 = arith.constant 0 : index
    %0 = vector.load %arg0[%c0, %c0_0] : memref<256x256xbf16, #tpu.memory_space<vmem>>, vector<256x256xbf16>
    %1 = arith.extf %0 : vector<256x256xbf16> to vector<256x256xf32>
    %c0_1 = arith.constant 0 : index
    %c0_2 = arith.constant 0 : index
    %2 = vector.load %arg2[%c0_1, %c0_2] : memref<1x256xf32, #tpu.memory_space<vmem>>, vector<1x256xf32>
    %c0_3 = arith.constant 0 : index
    %c0_4 = arith.constant 0 : index
    %3 = vector.load %arg1[%c0_3, %c0_4] : memref<8x256xf32, #tpu.memory_space<vmem>>, vector<8x256xf32>
    %cst = arith.constant dense<0.000000e+00> : vector<8x256xf32>
    %4 = tpu.matmul %3, %1, %cst {dimension_numbers = #tpu.dot_dimension_numbers<[1], [0], [0], [1], [0, 0, 1, 1], [], []>} : vector<8x256xf32>, vector<256x256xf32>, vector<8x256xf32> -> vector<8x256xf32>
    %5 = vector.broadcast %2 : vector<1x256xf32> to vector<8x256xf32>
    %6 = arith.mulf %4, %5 : vector<8x256xf32>
    %c0_5 = arith.constant 0 : index
    %c0_6 = arith.constant 0 : index
    %c0_7 = arith.constant 0 : index
    %7 = vector.load %arg3[%c0_5, %c0_6, %c0_7] : memref<2x8x256xf32, #tpu.memory_space<vmem>>, vector<1x8x256xf32>
    %8 = vector.shape_cast %7 : vector<1x8x256xf32> to vector<8x256xf32>
    %9 = vector.shape_cast %6 : vector<8x256xf32> to vector<1x8x256xf32>
    tpu.vector_store %arg3[%c0_5, %c0_6, %c0_7], %9 {strides = array<i32>} : memref<2x8x256xf32, #tpu.memory_space<vmem>>, vector<1x8x256xf32>,
    %cst_8 = arith.constant dense<0.000000e+00> : vector<8x256xf32>
    %10 = tpu.matmul %6, %1, %cst_8 {dimension_numbers = #tpu.dot_dimension_numbers<[1], [0], [0], [1], [0, 0, 1, 1], [], []>} : vector<8x256xf32>, vector<256x256xf32>, vector<8x256xf32> -> vector<8x256xf32>
    %11 = vector.broadcast %2 : vector<1x256xf32> to vector<8x256xf32>
    %12 = arith.mulf %10, %11 : vector<8x256xf32>
    %c1 = arith.constant 1 : index
    %c0_9 = arith.constant 0 : index
    %c0_10 = arith.constant 0 : index
    %13 = vector.load %arg3[%c1, %c0_9, %c0_10] : memref<2x8x256xf32, #tpu.memory_space<vmem>>, vector<1x8x256xf32>
    %14 = vector.shape_cast %13 : vector<1x8x256xf32> to vector<8x256xf32>
    %15 = vector.shape_cast %12 : vector<8x256xf32> to vector<1x8x256xf32>
    tpu.vector_store %arg3[%c1, %c0_9, %c0_10], %15 {strides = array<i32>} : memref<2x8x256xf32, #tpu.memory_space<vmem>>, vector<1x8x256xf32>,
    return
  }
}

</mosaic_0001>

<bundles_post_ra>
// kernel: forward.1
= control target key start
LH: loop header
LB: loop body
LE: loop exit
PB: predicated region body
PF: predicated region fallthrough
CT: control target
= control target key end

     0   :  { %v185_v34 = vlaneseq  ;;  %s658_s0 = inlined_call_operand.vmem [shape: bf16[256,256], index: 0, kind: input, shape index: {}]   ;;  %s659_s1 = inlined_call_operand.vmem [shape: f32[8,256], index: 1, kind: input, shape index: {}]   ;;  %s660_s2 = inlined_call_operand.vmem [shape: f32[1,256], index: 2, kind: input, shape index: {}]   ;;  %s661_s3 = inlined_call_operand.vmem [shape: f32[2,8,256], index: 3, kind: output, shape index: {}]  }
   0x1   :  { %v473_v0 = vld [vmem:[%s658_s0 + $0x4] ss:$8 sps:$4 sm:$0xff]   ;;  %v475_v1 = vld [vmem:[%s658_s0] ss:$8 sps:$4 sm:$0xff]   ;;  %v476_v2 = vld [vmem:[%s658_s0 + $0x14] ss:$8 sps:$4 sm:$0xff]  }
   0x2   :  { %282 = vmatprep.subr.bf16.mxu0 %v473_v0  ;;  %346 = vmatprep.subr.bf16.mxu1 %v473_v0  ;;  %v478_v3 = vld [vmem:[%s658_s0 + $0x10] ss:$8 sps:$4 sm:$0xff]   ;;  %v479_v4 = vld [vmem:[%s658_s0 + $0x24] ss:$8 sps:$4 sm:$0xff]   ;;  %v481_v5 = vld [vmem:[%s658_s0 + $0x20] ss:$8 sps:$4 sm:$0xff]  }
   0x3   :  { %284 = vmatpush1.bf16.msra.mxu0 %v475_v1  ;;  %348 = vmatpush1.bf16.msra.mxu1 %v475_v1  ;;  %v482_v6 = vld [vmem:[%s658_s0 + $0x34] ss:$8 sps:$4 sm:$0xff]   ;;  %v484_v7 = vld [vmem:[%s658_s0 + $0x30] ss:$8 sps:$4 sm:$0xff]   ;;  %v485_v8 = vld [vmem:[%s658_s0 + $0x44] ss:$8 sps:$4 sm:$0xff]  }
   0x4   :  { %286 = vmatprep.subr.bf16.mxu0 %v476_v2  ;;  %350 = vmatprep.subr.bf16.mxu1 %v476_v2  ;;  %v487_v9 = vld [vmem:[%s658_s0 + $0x40] ss:$8 sps:$4 sm:$0xff]   ;;  %v488_v10 = vld [vmem:[%s658_s0 + $0x54] ss:$8 sps:$4 sm:$0xff]   ;;  %v490_v11 = vld [vmem:[%s658_s0 + $0x50] ss:$8 sps:$4 sm:$0xff]  }
   0x5   :  { %v491_v12 = vld [vmem:[%s658_s0 + $0x64] ss:$8 sps:$4 sm:$0xff]   ;;  %v493_v14 = vld [vmem:[%s658_s0 + $0x60] ss:$8 sps:$4 sm:$0xff]   ;;  %v494_v15 = vld [vmem:[%s658_s0 + $0x74] ss:$8 sps:$4 sm:$0xff]  }
   0x6   :  { %v112_v13 = vld [vmem:[%s659_s1 + $0x8] sm:$0xff]  ;;  %v496_v16 = vld [vmem:[%s658_s0 + $0x70] ss:$8 sps:$4 sm:$0xff]   ;;  %v500_v19 = vld [vmem:[%s658_s0 + $0x94] ss:$8 sps:$4 sm:$0xff]   ;;  %v186_v35 = vshrl.u32 %v185_v34, 7 }
   0x7   :  { %288 = vmatpush1.bf16.msra.mxu0 %v478_v3  ;;  %352 = vmatpush1.bf16.msra.mxu1 %v478_v3  ;;  %v497_v17 = vld [vmem:[%s658_s0 + $0x84] ss:$8 sps:$4 sm:$0xff]   ;;  %v499_v18 = vld [vmem:[%s658_s0 + $0x80] ss:$8 sps:$4 sm:$0xff]   ;;  %v502_v20 = vld [vmem:[%s658_s0 + $0x90] ss:$8 sps:$4 sm:$0xff]  }
   0x8   :  { %290 = vmatprep.subr.bf16.mxu0 %v479_v4  ;;  %354 = vmatprep.subr.bf16.mxu1 %v479_v4  ;;  %v503_v21 = vld [vmem:[%s658_s0 + $0xa4] ss:$8 sps:$4 sm:$0xff]   ;;  %v505_v22 = vld [vmem:[%s658_s0 + $0xa0] ss:$8 sps:$4 sm:$0xff]   ;;  %v506_v23 = vld [vmem:[%s658_s0 + $0xb4] ss:$8 sps:$4 sm:$0xff]  }
   0x9   :  { %177 = vmatprep.mubr.f32.mxu0 %v112_v13  ;;  %v508_v24 = vld [vmem:[%s658_s0 + $0xb0] ss:$8 sps:$4 sm:$0xff]   ;;  %v509_v25 = vld [vmem:[%s658_s0 + $0xc4] ss:$8 sps:$4 sm:$0xff]   ;;  %v511_v26 = vld [vmem:[%s658_s0 + $0xc0] ss:$8 sps:$4 sm:$0xff]  }
   0xa   :  { %v512_v27 = vld [vmem:[%s658_s0 + $0xd4] ss:$8 sps:$4 sm:$0xff]   ;;  %v514_v28 = vld [vmem:[%s658_s0 + $0xd0] ss:$8 sps:$4 sm:$0xff]   ;;  %v515_v29 = vld [vmem:[%s658_s0 + $0xe4] ss:$8 sps:$4 sm:$0xff]  }
   0xb   :  { %292 = vmatpush1.bf16.msra.mxu0 %v481_v5  ;;  %356 = vmatpush1.bf16.msra.mxu1 %v481_v5  ;;  %v517_v30 = vld [vmem:[%s658_s0 + $0xe0] ss:$8 sps:$4 sm:$0xff]   ;;  %v518_v31 = vld [vmem:[%s658_s0 + $0xf4] ss:$8 sps:$4 sm:$0xff]   ;;  %v520_v32 = vld [vmem:[%s658_s0 + $0xf0] ss:$8 sps:$4 sm:$0xff]  }
   0xc   :  { %294 = vmatprep.subr.bf16.mxu0 %v482_v6  ;;  %358 = vmatprep.subr.bf16.mxu1 %v482_v6  ;;  %v111_v33 = vld [vmem:[%s659_s1] sm:$0xff]  ;;  %v187_v36 = vsub.s32 0, %v186_v35  ;;  %v191_v38 = vsub.s32 1, %v186_v35 }
   0xd   :  { %v110_v37 = vld [vmem:[%s660_s2] sm:$0x3] }
   0xe   :  { %v188_v39 = vrot.slane %v110_v37, %v187_v36  ;;  %v192_v40 = vrot.slane %v110_v37, %v191_v38 }
   0xf   :  { %296 = vmatpush1.bf16.msra.mxu0 %v484_v7  ;;  %360 = vmatpush1.bf16.msra.mxu1 %v484_v7 }
  0x10   :  { %298 = vmatprep.subr.bf16.mxu0 %v485_v8  ;;  %362 = vmatprep.subr.bf16.mxu1 %v485_v8 }
  0x13   :  { %300 = vmatpush1.bf16.msra.mxu0 %v487_v9  ;;  %364 = vmatpush1.bf16.msra.mxu1 %v487_v9 }
  0x14   :  { %302 = vmatprep.subr.bf16.mxu0 %v488_v10  ;;  %366 = vmatprep.subr.bf16.mxu1 %v488_v10 }
  0x17   :  { %304 = vmatpush1.bf16.msra.mxu0 %v490_v11  ;;  %368 = vmatpush1.bf16.msra.mxu1 %v490_v11 }
  0x18   :  { %306 = vmatprep.subr.bf16.mxu0 %v491_v12  ;;  %370 = vmatprep.subr.bf16.mxu1 %v491_v12 }
  0x1b   :  { %308 = vmatpush1.bf16.msra.mxu0 %v493_v14  ;;  %372 = vmatpush1.bf16.msra.mxu1 %v493_v14 }
  0x1c   :  { %310 = vmatprep.subr.bf16.mxu0 %v494_v15  ;;  %374 = vmatprep.subr.bf16.mxu1 %v494_v15 }
  0x1f   :  { %312 = vmatpush1.bf16.msra.mxu0 %v496_v16  ;;  %376 = vmatpush1.bf16.msra.mxu1 %v496_v16 }
  0x20   :  { %314 = vmatprep.subr.bf16.mxu0 %v497_v17  ;;  %378 = vmatprep.subr.bf16.mxu1 %v497_v17 }
  0x23   :  { %316 = vmatpush1.bf16.msra.mxu0 %v499_v18  ;;  %380 = vmatpush1.bf16.msra.mxu1 %v499_v18 }
  0x24   :  { %318 = vmatprep.subr.bf16.mxu0 %v500_v19  ;;  %382 = vmatprep.subr.bf16.mxu1 %v500_v19 }
  0x27   :  { %320 = vmatpush1.bf16.msra.mxu0 %v502_v20  ;;  %384 = vmatpush1.bf16.msra.mxu1 %v502_v20 }
  0x28   :  { %322 = vmatprep.subr.bf16.mxu0 %v503_v21  ;;  %386 = vmatprep.subr.bf16.mxu1 %v503_v21 }
  0x2b   :  { %324 = vmatpush1.bf16.msra.mxu0 %v505_v22  ;;  %388 = vmatpush1.bf16.msra.mxu1 %v505_v22 }
  0x2c   :  { %326 = vmatprep.subr.bf16.mxu0 %v506_v23  ;;  %390 = vmatprep.subr.bf16.mxu1 %v506_v23 }
  0x2f   :  { %328 = vmatpush1.bf16.msra.mxu0 %v508_v24  ;;  %392 = vmatpush1.bf16.msra.mxu1 %v508_v24 }
  0x30   :  { %330 = vmatprep.subr.bf16.mxu0 %v509_v25  ;;  %394 = vmatprep.subr.bf16.mxu1 %v509_v25 }
  0x33   :  { %332 = vmatpush1.bf16.msra.mxu0 %v511_v26  ;;  %396 = vmatpush1.bf16.msra.mxu1 %v511_v26 }
  0x34   :  { %334 = vmatprep.subr.bf16.mxu0 %v512_v27  ;;  %398 = vmatprep.subr.bf16.mxu1 %v512_v27 }
  0x37   :  { %336 = vmatpush1.bf16.msra.mxu0 %v514_v28  ;;  %400 = vmatpush1.bf16.msra.mxu1 %v514_v28 }
  0x38   :  { %338 = vmatprep.subr.bf16.mxu0 %v515_v29  ;;  %402 = vmatprep.subr.bf16.mxu1 %v515_v29 }
  0x3b   :  { %340 = vmatpush1.bf16.msra.mxu0 %v517_v30  ;;  %404 = vmatpush1.bf16.msra.mxu1 %v517_v30 }
  0x3c   :  { %342 = vmatprep.subr.bf16.mxu0 %v518_v31  ;;  %406 = vmatprep.subr.bf16.mxu1 %v518_v31 }
  0x3f   :  { %344 = vmatpush1.bf16.msra.mxu0 %v520_v32  ;;  %408 = vmatpush1.bf16.msra.mxu1 %v520_v32 }
  0x42   :  { %178 = vmatmul.mubr.f32.vlgmr.msra.gmra.mrb[0].mxu0 %v111_v33 }
 0x115   :  { %v179_v41 = vpop.f32.mrb[0].mxu0 }
 0x116   :  { %v195_v42 = vmul.f32 %v188_v39, %v179_v41  ;;  %v181_v43 = vpop.f32.mrb[1].mxu0 }
 0x117   :  { %v196_v44 = vmul.f32 %v192_v40, %v181_v43 }
 0x118   :  { %197 = vst [vmem:[%s661_s3] sm:$0xff] %v195_v42 }
 0x119   :  { %198 = vst [vmem:[%s661_s3 + $0x8] sm:$0xff] %v196_v44  ;;  %263 = vmatprep.mubr.f32.mxu1 %v196_v44 }
 0x11a   :  { %264 = vmatmul.mubr.f32.vlgmr.msra.gmra.mrb[0].mxu1 %v195_v42 }
 0x1ed   :  { %v265_v45 = vpop.f32.mrb[0].mxu1 }
 0x1ee   :  { %v270_v46 = vmul.f32 %v265_v45, %v188_v39  ;;  %v267_v47 = vpop.f32.mrb[1].mxu1 }
 0x1ef   :  { %v271_v48 = vmul.f32 %v267_v47, %v192_v40 }
 0x1f0   :  { %279 = vst [vmem:[%s661_s3 + $0x10] sm:$0xff] %v270_v46 }
 0x1f1   :  { %280 = vst [vmem:[%s661_s3 + $0x18] sm:$0xff] %v271_v48 }

</bundles_post_ra>
